<compile_context>
chip_gen: v7x
topology: tpu7x:2x2x1
jax: 0.10.0
libtpu: 0.0.40
codegen_flags: <defaults>
</compile_context>

<pallas_src>
import jax
import jax.numpy as jnp
from jax.experimental import pallas as pl
from jax.experimental.pallas import tpu as pltpu


# ----------------------------------------------------------------------------
# in-kernel helpers (traced inline, all operands resident in VMEM)
# ----------------------------------------------------------------------------
def _elu(x):
    # clamp the exp argument so the EUP never sees large positives
    return jnp.where(x > 0, x, jnp.exp(jnp.minimum(x, 0.0)) - 1.0)


def _gat_layer(h, adj, w_aug_ref, res_ref, *, heads, f_out, negative_slope,
               apply_elu):
    """One DGL-style GAT conv on resident values. h: (N, F_in) f32, adj: (N,N) f32 mask."""
    hb = h.astype(jnp.bfloat16)
    # single MXU pass produces features AND both attention logits (folded columns)
    feat_aug = jnp.dot(hb, w_aug_ref[...],
                       preferred_element_type=jnp.float32)       # (N, H*F + 2H)
    hf = heads * f_out
    feat = feat_aug[:, :hf]                                       # (N, H*F)
    el_t = feat_aug[:, hf:hf + heads].T                           # (H, N) src logits (a_l)
    er = feat_aug[:, hf + heads:hf + 2 * heads]                   # (N, H) dst logits (a_r)

    res = None
    if res_ref is not None:
        res = jnp.dot(hb, res_ref[...], preferred_element_type=jnp.float32)

    feat_b = feat.astype(jnp.bfloat16)
    outs = []
    for hd in range(heads):                                       # static unroll, H small
        e = er[:, hd:hd + 1] + el_t[hd:hd + 1, :]                 # (N_dst, N_src)
        e = jnp.where(e > 0, e, negative_slope * e)               # LeakyReLU
        m = jnp.max(jnp.where(adj > 0, e, -1e9), axis=1, keepdims=True)
        # unnormalized, masked softmax numerator (clamp keeps exp arg <= 0)
        p = jnp.exp(jnp.minimum(e - m, 0.0)) * adj
        l = jnp.sum(p, axis=1, keepdims=True)
        inv = jnp.where(l > 0, pl.reciprocal(l, approx=True), 0.0)
        out = jnp.dot(p.astype(jnp.bfloat16),
                      feat_b[:, hd * f_out:(hd + 1) * f_out],
                      preferred_element_type=jnp.float32) * inv   # deferred normalization
        if res is not None:
            out = out + res[:, hd * f_out:(hd + 1) * f_out]
        if apply_elu:
            out = _elu(out)
        outs.append(out)
    return outs[0] if heads == 1 else jnp.concatenate(outs, axis=1)


def _make_fused_kernel(layer_meta, negative_slope):
    def kernel(*refs):
        it = iter(refs)
        adj_ref = next(it)
        x_ref = next(it)
        w_in_ref = next(it)
        layer_refs = []
        for meta in layer_meta:
            w_aug_ref = next(it)
            res_ref = next(it) if meta["has_res"] else None
            layer_refs.append((w_aug_ref, res_ref))
        w_out_ref = next(it)
        o_ref = next(it)

        adj = adj_ref[...].astype(jnp.float32)      # 0/1 mask, reused across all layers
        # in_process linear
        h = jnp.dot(x_ref[...].astype(jnp.bfloat16), w_in_ref[...],
                    preferred_element_type=jnp.float32)

        # hidden GAT layers (heads concatenated == .flatten(1)) + output GAT layer
        for meta, (w_aug_ref, res_ref) in zip(layer_meta, layer_refs):
            h = _gat_layer(h, adj, w_aug_ref, res_ref,
                           heads=meta["heads"], f_out=meta["f_out"],
                           negative_slope=negative_slope,
                           apply_elu=meta["apply_elu"])

        # mean over heads of the output GAT layer, without a 3-D reshape
        last = layer_meta[-1]
        hh, ff = last["heads"], last["f_out"]
        if hh == 1:
            logits = h
        else:
            acc = h[:, :ff]
            for hd in range(1, hh):
                acc = acc + h[:, hd * ff:(hd + 1) * ff]
            logits = acc * (1.0 / hh)

        # TwoProcessedGAT tail: activation (ELU assumed) + out_process linear
        x = _elu(logits)
        o_ref[...] = jnp.dot(x.astype(jnp.bfloat16), w_out_ref[...],
                             preferred_element_type=jnp.float32)

    return kernel


# ----------------------------------------------------------------------------
# wrapper: fold attention vectors into W, assemble the fused call
# ----------------------------------------------------------------------------
def _fold_attention(W, a_l, a_r, heads, f_out):
    # W: (F_in, H*F_out); a_l, a_r: (H, F_out)
    f_in = W.shape[0]
    W3 = W.reshape(f_in, heads, f_out)
    w_l = jnp.einsum("fhd,hd->fh", W3, a_l)       # (F_in, H): columns = W_h @ a_l[h]
    w_r = jnp.einsum("fhd,hd->fh", W3, a_r)
    return jnp.concatenate([W, w_l, w_r], axis=1)  # (F_in, H*F_out + 2H)


def processed_gat_forward(adj, inputs, params, *, negative_slope):
    """adj: (N, N) dense adjacency, adj[dst, src] != 0 iff edge src->dst."""
    n = inputs.shape[0]
    layer_meta = []
    flat_inputs = [adj.astype(jnp.bfloat16),           # mask only -> half the HBM traffic
                   inputs.astype(jnp.float32),
                   params["w_in"].astype(jnp.bfloat16)]
    num_gat = len(params["layers"])
    for i, p in enumerate(params["layers"]):
        w_aug = _fold_attention(p["W"], p["a_l"], p["a_r"], p["heads"], p["f_out"])
        flat_inputs.append(w_aug.astype(jnp.bfloat16))
        has_res = p["res_W"] is not None
        if has_res:                                    # no dummy placeholder DMA
            flat_inputs.append(p["res_W"].astype(jnp.bfloat16))
        layer_meta.append(dict(heads=p["heads"], f_out=p["f_out"],
                               has_res=has_res,
                               apply_elu=(i < num_gat - 1)))
    flat_inputs.append(params["w_out"].astype(jnp.bfloat16))

    num_classes = params["w_out"].shape[1]
    kernel = _make_fused_kernel(tuple(layer_meta), negative_slope)
    vmem = pl.BlockSpec(memory_space=pltpu.MemorySpace.VMEM)
    return pl.pallas_call(
        kernel,
        out_shape=jax.ShapeDtypeStruct((n, num_classes), jnp.float32),
        in_specs=[vmem] * len(flat_inputs),
        out_specs=vmem,
    )(*flat_inputs)


# ----------------------------------------------------------------------------
# deterministic parameters + demo
# ----------------------------------------------------------------------------
if __name__ == "__main__":
    # model config (small demo shapes)
    N = 16                 # number of graph nodes
    in_dim = 32            # raw input feature dim
    reduced_dim = 16       # in_process output dim
    num_hidden = 8         # per-head hidden dim (also output-GAT per-head dim)
    num_classes = 8        # out_process output classes
    num_layers = 2
    heads = [2, 2, 1]      # len == num_layers + 1
    negative_slope = 0.2
    residual = True
    # feat_drop = attn_drop = 0.0 -> dropout is identity at inference

    key = jax.random.PRNGKey(0)
    keys = jax.random.split(key, 20)

    def init(k, shape, fan_in):
        return (jax.random.normal(k, shape, jnp.float32) /
                jnp.sqrt(jnp.float32(fan_in)))

    params = {"w_in": init(keys[0], (in_dim, reduced_dim), in_dim)}

    layers = []
    in_d = reduced_dim
    ki = 1
    for l in range(num_layers):
        hcnt = heads[l]
        W = init(keys[ki], (in_d, hcnt * num_hidden), in_d); ki += 1
        a_l = init(keys[ki], (hcnt, num_hidden), num_hidden); ki += 1
        a_r = init(keys[ki], (hcnt, num_hidden), num_hidden); ki += 1
        res_W = None
        if l > 0 and residual:            # first GAT layer built with residual=False
            res_W = init(keys[ki], (in_d, hcnt * num_hidden), in_d); ki += 1
        layers.append(dict(W=W, a_l=a_l, a_r=a_r, res_W=res_W,
                           heads=hcnt, f_out=num_hidden))
        in_d = hcnt * num_hidden

    # output GAT layer: base class is constructed with num_classes = num_hidden,
    # so the last GAT layer emits num_hidden features per head.
    hcnt = heads[-1]
    W = init(keys[ki], (in_d, hcnt * num_hidden), in_d); ki += 1
    a_l = init(keys[ki], (hcnt, num_hidden), num_hidden); ki += 1
    a_r = init(keys[ki], (hcnt, num_hidden), num_hidden); ki += 1
    res_W = init(keys[ki], (in_d, hcnt * num_hidden), in_d) if residual else None
    ki += 1
    layers.append(dict(W=W, a_l=a_l, a_r=a_r, res_W=res_W,
                       heads=hcnt, f_out=num_hidden))
    params["layers"] = layers

    # out_process: Linear(num_hidden, num_classes, bias=False)
    params["w_out"] = init(keys[ki], (num_hidden, num_classes), num_hidden); ki += 1

    # deterministic graph: ring + self loops; adj[dst, src]
    idx = jnp.arange(N)
    adj = jnp.zeros((N, N), jnp.float32)
    adj = adj.at[idx, idx].set(1.0)
    adj = adj.at[idx, (idx + 1) % N].set(1.0)
    adj = adj.at[idx, (idx - 1) % N].set(1.0)

    x = jax.random.normal(keys[ki], (N, in_dim), jnp.float32)

    logits = processed_gat_forward(adj, x, params, negative_slope=negative_slope)
    jax.block_until_ready(logits)
    assert logits.shape == (N, num_classes)
    assert bool(jnp.all(jnp.isfinite(logits)))
    print("KERNEL_OK")
</pallas_src>

<mosaic_0001>
module attributes {stable_mosaic.version = 11 : i64} {
  func.func @kernel(%arg0: memref<16x16xbf16, #tpu.memory_space<vmem>>, %arg1: memref<16x32xf32, #tpu.memory_space<vmem>>, %arg2: memref<32x16xbf16, #tpu.memory_space<vmem>>, %arg3: memref<16x20xbf16, #tpu.memory_space<vmem>>, %arg4: memref<16x20xbf16, #tpu.memory_space<vmem>>, %arg5: memref<16x16xbf16, #tpu.memory_space<vmem>>, %arg6: memref<16x10xbf16, #tpu.memory_space<vmem>>, %arg7: memref<16x8xbf16, #tpu.memory_space<vmem>>, %arg8: memref<8x8xbf16, #tpu.memory_space<vmem>>, %arg9: memref<16x8xf32, #tpu.memory_space<vmem>>) attributes {dimension_semantics = [], scalar_prefetch = 0 : i64, scratch_operands = 0 : i64, tpu.core_type = #tpu.core_type<tc>} {
    %c0 = arith.constant 0 : index
    %c0_0 = arith.constant 0 : index
    %0 = vector.load %arg0[%c0, %c0_0] : memref<16x16xbf16, #tpu.memory_space<vmem>>, vector<16x16xbf16>
    %1 = arith.extf %0 : vector<16x16xbf16> to vector<16x16xf32>
    %c0_1 = arith.constant 0 : index
    %c0_2 = arith.constant 0 : index
    %2 = vector.load %arg1[%c0_1, %c0_2] : memref<16x32xf32, #tpu.memory_space<vmem>>, vector<16x32xf32>
    %3 = arith.truncf %2 : vector<16x32xf32> to vector<16x32xbf16>
    %c0_3 = arith.constant 0 : index
    %c0_4 = arith.constant 0 : index
    %4 = vector.load %arg2[%c0_3, %c0_4] : memref<32x16xbf16, #tpu.memory_space<vmem>>, vector<32x16xbf16>
    %cst = arith.constant dense<0.000000e+00> : vector<16x16xf32>
    %5 = tpu.matmul %3, %4, %cst {dimension_numbers = #tpu.dot_dimension_numbers<[1], [0], [0], [1], [0, 0, 1, 1], [], []>} : vector<16x32xbf16>, vector<32x16xbf16>, vector<16x16xf32> -> vector<16x16xf32>
    %6 = arith.truncf %5 : vector<16x16xf32> to vector<16x16xbf16>
    %c0_5 = arith.constant 0 : index
    %c0_6 = arith.constant 0 : index
    %7 = vector.load %arg3[%c0_5, %c0_6] : memref<16x20xbf16, #tpu.memory_space<vmem>>, vector<16x20xbf16>
    %cst_7 = arith.constant dense<0.000000e+00> : vector<16x20xf32>
    %8 = tpu.matmul %6, %7, %cst_7 {dimension_numbers = #tpu.dot_dimension_numbers<[1], [0], [0], [1], [0, 0, 1, 1], [], []>} : vector<16x16xbf16>, vector<16x20xbf16>, vector<16x20xf32> -> vector<16x20xf32>
    %9 = vector.extract_strided_slice %8 {offsets = [0, 0], sizes = [16, 16], strides = [1, 1]} : vector<16x20xf32> to vector<16x16xf32>
    %10 = vector.extract_strided_slice %8 {offsets = [0, 16], sizes = [16, 2], strides = [1, 1]} : vector<16x20xf32> to vector<16x2xf32>
    %11 = tpu.transpose %10, [1, 0] : vector<16x2xf32> -> vector<2x16xf32>
    %12 = vector.extract_strided_slice %8 {offsets = [0, 18], sizes = [16, 2], strides = [1, 1]} : vector<16x20xf32> to vector<16x2xf32>
    %13 = arith.truncf %9 : vector<16x16xf32> to vector<16x16xbf16>
    %14 = vector.extract_strided_slice %12 {offsets = [0, 0], sizes = [16, 1], strides = [1, 1]} : vector<16x2xf32> to vector<16x1xf32>
    %15 = vector.extract_strided_slice %11 {offsets = [0, 0], sizes = [1, 16], strides = [1, 1]} : vector<2x16xf32> to vector<1x16xf32>
    %16 = vector.broadcast %14 : vector<16x1xf32> to vector<16x16xf32>
    %17 = vector.broadcast %15 : vector<1x16xf32> to vector<16x16xf32>
    %18 = arith.addf %16, %17 : vector<16x16xf32>
    %cst_8 = arith.constant 0.000000e+00 : f32
    %19 = vector.broadcast %cst_8 : f32 to vector<16x16xf32>
    %20 = arith.cmpf ogt, %18, %19 : vector<16x16xf32>
    %cst_9 = arith.constant 2.000000e-01 : f32
    %21 = vector.broadcast %cst_9 : f32 to vector<16x16xf32>
    %22 = arith.mulf %21, %18 : vector<16x16xf32>
    %23 = arith.select %20, %18, %22 : vector<16x16xi1>, vector<16x16xf32>
    %cst_10 = arith.constant 0.000000e+00 : f32
    %24 = vector.broadcast %cst_10 : f32 to vector<16x16xf32>
    %25 = arith.cmpf ogt, %1, %24 : vector<16x16xf32>
    %cst_11 = arith.constant -1.000000e+09 : f32
    %26 = vector.broadcast %cst_11 : f32 to vector<16x16xf32>
    %27 = arith.select %25, %23, %26 : vector<16x16xi1>, vector<16x16xf32>
    %cst_12 = arith.constant dense<0xFF800000> : vector<16xf32>
    %28 = vector.multi_reduction <maximumf>, %27, %cst_12 [1] : vector<16x16xf32> to vector<16xf32>
    %29 = vector.shape_cast %28 : vector<16xf32> to vector<16x1xf32>
    %30 = vector.broadcast %29 : vector<16x1xf32> to vector<16x16xf32>
    %31 = arith.subf %23, %30 : vector<16x16xf32>
    %cst_13 = arith.constant 0.000000e+00 : f32
    %32 = vector.broadcast %cst_13 : f32 to vector<16x16xf32>
    %33 = arith.minimumf %31, %32 : vector<16x16xf32>
    %34 = math.exp %33 : vector<16x16xf32>
    %35 = arith.mulf %34, %1 : vector<16x16xf32>
    %cst_14 = arith.constant dense<0.000000e+00> : vector<16xf32>
    %36 = vector.multi_reduction <add>, %35, %cst_14 [1] : vector<16x16xf32> to vector<16xf32>
    %37 = vector.shape_cast %36 : vector<16xf32> to vector<16x1xf32>
    %cst_15 = arith.constant 0.000000e+00 : f32
    %38 = vector.broadcast %cst_15 : f32 to vector<16x1xf32>
    %39 = arith.cmpf ogt, %37, %38 : vector<16x1xf32>
    %40 = tpu.reciprocal %37 {approx = true} : vector<16x1xf32> -> vector<16x1xf32>
    %cst_16 = arith.constant 0.000000e+00 : f32
    %41 = vector.broadcast %cst_16 : f32 to vector<16x1xf32>
    %42 = arith.select %39, %40, %41 : vector<16x1xi1>, vector<16x1xf32>
    %43 = arith.truncf %35 : vector<16x16xf32> to vector<16x16xbf16>
    %44 = vector.extract_strided_slice %13 {offsets = [0, 0], sizes = [16, 8], strides = [1, 1]} : vector<16x16xbf16> to vector<16x8xbf16>
    %cst_17 = arith.constant dense<0.000000e+00> : vector<16x8xf32>
    %45 = tpu.matmul %43, %44, %cst_17 {dimension_numbers = #tpu.dot_dimension_numbers<[1], [0], [0], [1], [0, 0, 1, 1], [], []>} : vector<16x16xbf16>, vector<16x8xbf16>, vector<16x8xf32> -> vector<16x8xf32>
    %46 = vector.broadcast %42 : vector<16x1xf32> to vector<16x8xf32>
    %47 = arith.mulf %45, %46 : vector<16x8xf32>
    %cst_18 = arith.constant 0.000000e+00 : f32
    %48 = vector.broadcast %cst_18 : f32 to vector<16x8xf32>
    %49 = arith.cmpf ogt, %47, %48 : vector<16x8xf32>
    %cst_19 = arith.constant 0.000000e+00 : f32
    %50 = vector.broadcast %cst_19 : f32 to vector<16x8xf32>
    %51 = arith.minimumf %47, %50 : vector<16x8xf32>
    %52 = math.exp %51 : vector<16x8xf32>
    %cst_20 = arith.constant 1.000000e+00 : f32
    %53 = vector.broadcast %cst_20 : f32 to vector<16x8xf32>
    %54 = arith.subf %52, %53 : vector<16x8xf32>
    %55 = arith.select %49, %47, %54 : vector<16x8xi1>, vector<16x8xf32>
    %56 = vector.extract_strided_slice %12 {offsets = [0, 1], sizes = [16, 1], strides = [1, 1]} : vector<16x2xf32> to vector<16x1xf32>
    %57 = vector.extract_strided_slice %11 {offsets = [1, 0], sizes = [1, 16], strides = [1, 1]} : vector<2x16xf32> to vector<1x16xf32>
    %58 = vector.broadcast %56 : vector<16x1xf32> to vector<16x16xf32>
    %59 = vector.broadcast %57 : vector<1x16xf32> to vector<16x16xf32>
    %60 = arith.addf %58, %59 : vector<16x16xf32>
    %cst_21 = arith.constant 0.000000e+00 : f32
    %61 = vector.broadcast %cst_21 : f32 to vector<16x16xf32>
    %62 = arith.cmpf ogt, %60, %61 : vector<16x16xf32>
    %cst_22 = arith.constant 2.000000e-01 : f32
    %63 = vector.broadcast %cst_22 : f32 to vector<16x16xf32>
    %64 = arith.mulf %63, %60 : vector<16x16xf32>
    %65 = arith.select %62, %60, %64 : vector<16x16xi1>, vector<16x16xf32>
    %cst_23 = arith.constant 0.000000e+00 : f32
    %66 = vector.broadcast %cst_23 : f32 to vector<16x16xf32>
    %67 = arith.cmpf ogt, %1, %66 : vector<16x16xf32>
    %cst_24 = arith.constant -1.000000e+09 : f32
    %68 = vector.broadcast %cst_24 : f32 to vector<16x16xf32>
    %69 = arith.select %67, %65, %68 : vector<16x16xi1>, vector<16x16xf32>
    %cst_25 = arith.constant dense<0xFF800000> : vector<16xf32>
    %70 = vector.multi_reduction <maximumf>, %69, %cst_25 [1] : vector<16x16xf32> to vector<16xf32>
    %71 = vector.shape_cast %70 : vector<16xf32> to vector<16x1xf32>
    %72 = vector.broadcast %71 : vector<16x1xf32> to vector<16x16xf32>
    %73 = arith.subf %65, %72 : vector<16x16xf32>
    %cst_26 = arith.constant 0.000000e+00 : f32
    %74 = vector.broadcast %cst_26 : f32 to vector<16x16xf32>
    %75 = arith.minimumf %73, %74 : vector<16x16xf32>
    %76 = math.exp %75 : vector<16x16xf32>
    %77 = arith.mulf %76, %1 : vector<16x16xf32>
    %cst_27 = arith.constant dense<0.000000e+00> : vector<16xf32>
    %78 = vector.multi_reduction <add>, %77, %cst_27 [1] : vector<16x16xf32> to vector<16xf32>
    %79 = vector.shape_cast %78 : vector<16xf32> to vector<16x1xf32>
    %cst_28 = arith.constant 0.000000e+00 : f32
    %80 = vector.broadcast %cst_28 : f32 to vector<16x1xf32>
    %81 = arith.cmpf ogt, %79, %80 : vector<16x1xf32>
    %82 = tpu.reciprocal %79 {approx = true} : vector<16x1xf32> -> vector<16x1xf32>
    %cst_29 = arith.constant 0.000000e+00 : f32
    %83 = vector.broadcast %cst_29 : f32 to vector<16x1xf32>
    %84 = arith.select %81, %82, %83 : vector<16x1xi1>, vector<16x1xf32>
    %85 = arith.truncf %77 : vector<16x16xf32> to vector<16x16xbf16>
    %86 = vector.extract_strided_slice %13 {offsets = [0, 8], sizes = [16, 8], strides = [1, 1]} : vector<16x16xbf16> to vector<16x8xbf16>
    %cst_30 = arith.constant dense<0.000000e+00> : vector<16x8xf32>
    %87 = tpu.matmul %85, %86, %cst_30 {dimension_numbers = #tpu.dot_dimension_numbers<[1], [0], [0], [1], [0, 0, 1, 1], [], []>} : vector<16x16xbf16>, vector<16x8xbf16>, vector<16x8xf32> -> vector<16x8xf32>
    %88 = vector.broadcast %84 : vector<16x1xf32> to vector<16x8xf32>
    %89 = arith.mulf %87, %88 : vector<16x8xf32>
    %cst_31 = arith.constant 0.000000e+00 : f32
    %90 = vector.broadcast %cst_31 : f32 to vector<16x8xf32>
    %91 = arith.cmpf ogt, %89, %90 : vector<16x8xf32>
    %cst_32 = arith.constant 0.000000e+00 : f32
    %92 = vector.broadcast %cst_32 : f32 to vector<16x8xf32>
    %93 = arith.minimumf %89, %92 : vector<16x8xf32>
    %94 = math.exp %93 : vector<16x8xf32>
    %cst_33 = arith.constant 1.000000e+00 : f32
    %95 = vector.broadcast %cst_33 : f32 to vector<16x8xf32>
    %96 = arith.subf %94, %95 : vector<16x8xf32>
    %97 = arith.select %91, %89, %96 : vector<16x8xi1>, vector<16x8xf32>
    %98 = tpu.concatenate %55, %97 in 1 : vector<16x8xf32>, vector<16x8xf32> -> vector<16x16xf32>
    %99 = arith.truncf %98 : vector<16x16xf32> to vector<16x16xbf16>
    %c0_34 = arith.constant 0 : index
    %c0_35 = arith.constant 0 : index
    %100 = vector.load %arg4[%c0_34, %c0_35] : memref<16x20xbf16, #tpu.memory_space<vmem>>, vector<16x20xbf16>
    %cst_36 = arith.constant dense<0.000000e+00> : vector<16x20xf32>
    %101 = tpu.matmul %99, %100, %cst_36 {dimension_numbers = #tpu.dot_dimension_numbers<[1], [0], [0], [1], [0, 0, 1, 1], [], []>} : vector<16x16xbf16>, vector<16x20xbf16>, vector<16x20xf32> -> vector<16x20xf32>
    %102 = vector.extract_strided_slice %101 {offsets = [0, 0], sizes = [16, 16], strides = [1, 1]} : vector<16x20xf32> to vector<16x16xf32>
    %103 = vector.extract_strided_slice %101 {offsets = [0, 16], sizes = [16, 2], strides = [1, 1]} : vector<16x20xf32> to vector<16x2xf32>
    %104 = tpu.transpose %103, [1, 0] : vector<16x2xf32> -> vector<2x16xf32>
    %105 = vector.extract_strided_slice %101 {offsets = [0, 18], sizes = [16, 2], strides = [1, 1]} : vector<16x20xf32> to vector<16x2xf32>
    %c0_37 = arith.constant 0 : index
    %c0_38 = arith.constant 0 : index
    %106 = vector.load %arg5[%c0_37, %c0_38] : memref<16x16xbf16, #tpu.memory_space<vmem>>, vector<16x16xbf16>
    %cst_39 = arith.constant dense<0.000000e+00> : vector<16x16xf32>
    %107 = tpu.matmul %99, %106, %cst_39 {dimension_numbers = #tpu.dot_dimension_numbers<[1], [0], [0], [1], [0, 0, 1, 1], [], []>} : vector<16x16xbf16>, vector<16x16xbf16>, vector<16x16xf32> -> vector<16x16xf32>
    %108 = arith.truncf %102 : vector<16x16xf32> to vector<16x16xbf16>
    %109 = vector.extract_strided_slice %105 {offsets = [0, 0], sizes = [16, 1], strides = [1, 1]} : vector<16x2xf32> to vector<16x1xf32>
    %110 = vector.extract_strided_slice %104 {offsets = [0, 0], sizes = [1, 16], strides = [1, 1]} : vector<2x16xf32> to vector<1x16xf32>
    %111 = vector.broadcast %109 : vector<16x1xf32> to vector<16x16xf32>
    %112 = vector.broadcast %110 : vector<1x16xf32> to vector<16x16xf32>
    %113 = arith.addf %111, %112 : vector<16x16xf32>
    %cst_40 = arith.constant 0.000000e+00 : f32
    %114 = vector.broadcast %cst_40 : f32 to vector<16x16xf32>
    %115 = arith.cmpf ogt, %113, %114 : vector<16x16xf32>
    %cst_41 = arith.constant 2.000000e-01 : f32
    %116 = vector.broadcast %cst_41 : f32 to vector<16x16xf32>
    %117 = arith.mulf %116, %113 : vector<16x16xf32>
    %118 = arith.select %115, %113, %117 : vector<16x16xi1>, vector<16x16xf32>
    %cst_42 = arith.constant 0.000000e+00 : f32
    %119 = vector.broadcast %cst_42 : f32 to vector<16x16xf32>
    %120 = arith.cmpf ogt, %1, %119 : vector<16x16xf32>
    %cst_43 = arith.constant -1.000000e+09 : f32
    %121 = vector.broadcast %cst_43 : f32 to vector<16x16xf32>
    %122 = arith.select %120, %118, %121 : vector<16x16xi1>, vector<16x16xf32>
    %cst_44 = arith.constant dense<0xFF800000> : vector<16xf32>
    %123 = vector.multi_reduction <maximumf>, %122, %cst_44 [1] : vector<16x16xf32> to vector<16xf32>
    %124 = vector.shape_cast %123 : vector<16xf32> to vector<16x1xf32>
    %125 = vector.broadcast %124 : vector<16x1xf32> to vector<16x16xf32>
    %126 = arith.subf %118, %125 : vector<16x16xf32>
    %cst_45 = arith.constant 0.000000e+00 : f32
    %127 = vector.broadcast %cst_45 : f32 to vector<16x16xf32>
    %128 = arith.minimumf %126, %127 : vector<16x16xf32>
    %129 = math.exp %128 : vector<16x16xf32>
    %130 = arith.mulf %129, %1 : vector<16x16xf32>
    %cst_46 = arith.constant dense<0.000000e+00> : vector<16xf32>
    %131 = vector.multi_reduction <add>, %130, %cst_46 [1] : vector<16x16xf32> to vector<16xf32>
    %132 = vector.shape_cast %131 : vector<16xf32> to vector<16x1xf32>
    %cst_47 = arith.constant 0.000000e+00 : f32
    %133 = vector.broadcast %cst_47 : f32 to vector<16x1xf32>
    %134 = arith.cmpf ogt, %132, %133 : vector<16x1xf32>
    %135 = tpu.reciprocal %132 {approx = true} : vector<16x1xf32> -> vector<16x1xf32>
    %cst_48 = arith.constant 0.000000e+00 : f32
    %136 = vector.broadcast %cst_48 : f32 to vector<16x1xf32>
    %137 = arith.select %134, %135, %136 : vector<16x1xi1>, vector<16x1xf32>
    %138 = arith.truncf %130 : vector<16x16xf32> to vector<16x16xbf16>
    %139 = vector.extract_strided_slice %108 {offsets = [0, 0], sizes = [16, 8], strides = [1, 1]} : vector<16x16xbf16> to vector<16x8xbf16>
    %cst_49 = arith.constant dense<0.000000e+00> : vector<16x8xf32>
    %140 = tpu.matmul %138, %139, %cst_49 {dimension_numbers = #tpu.dot_dimension_numbers<[1], [0], [0], [1], [0, 0, 1, 1], [], []>} : vector<16x16xbf16>, vector<16x8xbf16>, vector<16x8xf32> -> vector<16x8xf32>
    %141 = vector.broadcast %137 : vector<16x1xf32> to vector<16x8xf32>
    %142 = arith.mulf %140, %141 : vector<16x8xf32>
    %143 = vector.extract_strided_slice %107 {offsets = [0, 0], sizes = [16, 8], strides = [1, 1]} : vector<16x16xf32> to vector<16x8xf32>
    %144 = arith.addf %142, %143 : vector<16x8xf32>
    %cst_50 = arith.constant 0.000000e+00 : f32
    %145 = vector.broadcast %cst_50 : f32 to vector<16x8xf32>
    %146 = arith.cmpf ogt, %144, %145 : vector<16x8xf32>
    %cst_51 = arith.constant 0.000000e+00 : f32
    %147 = vector.broadcast %cst_51 : f32 to vector<16x8xf32>
    %148 = arith.minimumf %144, %147 : vector<16x8xf32>
    %149 = math.exp %148 : vector<16x8xf32>
    %cst_52 = arith.constant 1.000000e+00 : f32
    %150 = vector.broadcast %cst_52 : f32 to vector<16x8xf32>
    %151 = arith.subf %149, %150 : vector<16x8xf32>
    %152 = arith.select %146, %144, %151 : vector<16x8xi1>, vector<16x8xf32>
    %153 = vector.extract_strided_slice %105 {offsets = [0, 1], sizes = [16, 1], strides = [1, 1]} : vector<16x2xf32> to vector<16x1xf32>
    %154 = vector.extract_strided_slice %104 {offsets = [1, 0], sizes = [1, 16], strides = [1, 1]} : vector<2x16xf32> to vector<1x16xf32>
    %155 = vector.broadcast %153 : vector<16x1xf32> to vector<16x16xf32>
    %156 = vector.broadcast %154 : vector<1x16xf32> to vector<16x16xf32>
    %157 = arith.addf %155, %156 : vector<16x16xf32>
    %cst_53 = arith.constant 0.000000e+00 : f32
    %158 = vector.broadcast %cst_53 : f32 to vector<16x16xf32>
    %159 = arith.cmpf ogt, %157, %158 : vector<16x16xf32>
    %cst_54 = arith.constant 2.000000e-01 : f32
    %160 = vector.broadcast %cst_54 : f32 to vector<16x16xf32>
    %161 = arith.mulf %160, %157 : vector<16x16xf32>
    %162 = arith.select %159, %157, %161 : vector<16x16xi1>, vector<16x16xf32>
    %cst_55 = arith.constant 0.000000e+00 : f32
    %163 = vector.broadcast %cst_55 : f32 to vector<16x16xf32>
    %164 = arith.cmpf ogt, %1, %163 : vector<16x16xf32>
    %cst_56 = arith.constant -1.000000e+09 : f32
    %165 = vector.broadcast %cst_56 : f32 to vector<16x16xf32>
    %166 = arith.select %164, %162, %165 : vector<16x16xi1>, vector<16x16xf32>
    %cst_57 = arith.constant dense<0xFF800000> : vector<16xf32>
    %167 = vector.multi_reduction <maximumf>, %166, %cst_57 [1] : vector<16x16xf32> to vector<16xf32>
    %168 = vector.shape_cast %167 : vector<16xf32> to vector<16x1xf32>
    %169 = vector.broadcast %168 : vector<16x1xf32> to vector<16x16xf32>
    %170 = arith.subf %162, %169 : vector<16x16xf32>
    %cst_58 = arith.constant 0.000000e+00 : f32
    %171 = vector.broadcast %cst_58 : f32 to vector<16x16xf32>
    %172 = arith.minimumf %170, %171 : vector<16x16xf32>
    %173 = math.exp %172 : vector<16x16xf32>
    %174 = arith.mulf %173, %1 : vector<16x16xf32>
    %cst_59 = arith.constant dense<0.000000e+00> : vector<16xf32>
    %175 = vector.multi_reduction <add>, %174, %cst_59 [1] : vector<16x16xf32> to vector<16xf32>
    %176 = vector.shape_cast %175 : vector<16xf32> to vector<16x1xf32>
    %cst_60 = arith.constant 0.000000e+00 : f32
    %177 = vector.broadcast %cst_60 : f32 to vector<16x1xf32>
    %178 = arith.cmpf ogt, %176, %177 : vector<16x1xf32>
    %179 = tpu.reciprocal %176 {approx = true} : vector<16x1xf32> -> vector<16x1xf32>
    %cst_61 = arith.constant 0.000000e+00 : f32
    %180 = vector.broadcast %cst_61 : f32 to vector<16x1xf32>
    %181 = arith.select %178, %179, %180 : vector<16x1xi1>, vector<16x1xf32>
    %182 = arith.truncf %174 : vector<16x16xf32> to vector<16x16xbf16>
    %183 = vector.extract_strided_slice %108 {offsets = [0, 8], sizes = [16, 8], strides = [1, 1]} : vector<16x16xbf16> to vector<16x8xbf16>
    %cst_62 = arith.constant dense<0.000000e+00> : vector<16x8xf32>
    %184 = tpu.matmul %182, %183, %cst_62 {dimension_numbers = #tpu.dot_dimension_numbers<[1], [0], [0], [1], [0, 0, 1, 1], [], []>} : vector<16x16xbf16>, vector<16x8xbf16>, vector<16x8xf32> -> vector<16x8xf32>
    %185 = vector.broadcast %181 : vector<16x1xf32> to vector<16x8xf32>
    %186 = arith.mulf %184, %185 : vector<16x8xf32>
    %187 = vector.extract_strided_slice %107 {offsets = [0, 8], sizes = [16, 8], strides = [1, 1]} : vector<16x16xf32> to vector<16x8xf32>
    %188 = arith.addf %186, %187 : vector<16x8xf32>
    %cst_63 = arith.constant 0.000000e+00 : f32
    %189 = vector.broadcast %cst_63 : f32 to vector<16x8xf32>
    %190 = arith.cmpf ogt, %188, %189 : vector<16x8xf32>
    %cst_64 = arith.constant 0.000000e+00 : f32
    %191 = vector.broadcast %cst_64 : f32 to vector<16x8xf32>
    %192 = arith.minimumf %188, %191 : vector<16x8xf32>
    %193 = math.exp %192 : vector<16x8xf32>
    %cst_65 = arith.constant 1.000000e+00 : f32
    %194 = vector.broadcast %cst_65 : f32 to vector<16x8xf32>
    %195 = arith.subf %193, %194 : vector<16x8xf32>
    %196 = arith.select %190, %188, %195 : vector<16x8xi1>, vector<16x8xf32>
    %197 = tpu.concatenate %152, %196 in 1 : vector<16x8xf32>, vector<16x8xf32> -> vector<16x16xf32>
    %198 = arith.truncf %197 : vector<16x16xf32> to vector<16x16xbf16>
    %c0_66 = arith.constant 0 : index
    %c0_67 = arith.constant 0 : index
    %199 = vector.load %arg6[%c0_66, %c0_67] : memref<16x10xbf16, #tpu.memory_space<vmem>>, vector<16x10xbf16>
    %cst_68 = arith.constant dense<0.000000e+00> : vector<16x10xf32>
    %200 = tpu.matmul %198, %199, %cst_68 {dimension_numbers = #tpu.dot_dimension_numbers<[1], [0], [0], [1], [0, 0, 1, 1], [], []>} : vector<16x16xbf16>, vector<16x10xbf16>, vector<16x10xf32> -> vector<16x10xf32>
    %201 = vector.extract_strided_slice %200 {offsets = [0, 0], sizes = [16, 8], strides = [1, 1]} : vector<16x10xf32> to vector<16x8xf32>
    %202 = vector.extract_strided_slice %200 {offsets = [0, 8], sizes = [16, 1], strides = [1, 1]} : vector<16x10xf32> to vector<16x1xf32>
    %203 = tpu.transpose %202, [1, 0] : vector<16x1xf32> -> vector<1x16xf32>
    %204 = vector.extract_strided_slice %200 {offsets = [0, 9], sizes = [16, 1], strides = [1, 1]} : vector<16x10xf32> to vector<16x1xf32>
    %c0_69 = arith.constant 0 : index
    %c0_70 = arith.constant 0 : index
    %205 = vector.load %arg7[%c0_69, %c0_70] : memref<16x8xbf16, #tpu.memory_space<vmem>>, vector<16x8xbf16>
    %cst_71 = arith.constant dense<0.000000e+00> : vector<16x8xf32>
    %206 = tpu.matmul %198, %205, %cst_71 {dimension_numbers = #tpu.dot_dimension_numbers<[1], [0], [0], [1], [0, 0, 1, 1], [], []>} : vector<16x16xbf16>, vector<16x8xbf16>, vector<16x8xf32> -> vector<16x8xf32>
    %207 = arith.truncf %201 : vector<16x8xf32> to vector<16x8xbf16>
    %208 = vector.broadcast %204 : vector<16x1xf32> to vector<16x16xf32>
    %209 = vector.broadcast %203 : vector<1x16xf32> to vector<16x16xf32>
    %210 = arith.addf %208, %209 : vector<16x16xf32>
    %cst_72 = arith.constant 0.000000e+00 : f32
    %211 = vector.broadcast %cst_72 : f32 to vector<16x16xf32>
    %212 = arith.cmpf ogt, %210, %211 : vector<16x16xf32>
    %cst_73 = arith.constant 2.000000e-01 : f32
    %213 = vector.broadcast %cst_73 : f32 to vector<16x16xf32>
    %214 = arith.mulf %213, %210 : vector<16x16xf32>
    %215 = arith.select %212, %210, %214 : vector<16x16xi1>, vector<16x16xf32>
    %cst_74 = arith.constant 0.000000e+00 : f32
    %216 = vector.broadcast %cst_74 : f32 to vector<16x16xf32>
    %217 = arith.cmpf ogt, %1, %216 : vector<16x16xf32>
    %cst_75 = arith.constant -1.000000e+09 : f32
    %218 = vector.broadcast %cst_75 : f32 to vector<16x16xf32>
    %219 = arith.select %217, %215, %218 : vector<16x16xi1>, vector<16x16xf32>
    %cst_76 = arith.constant dense<0xFF800000> : vector<16xf32>
    %220 = vector.multi_reduction <maximumf>, %219, %cst_76 [1] : vector<16x16xf32> to vector<16xf32>
    %221 = vector.shape_cast %220 : vector<16xf32> to vector<16x1xf32>
    %222 = vector.broadcast %221 : vector<16x1xf32> to vector<16x16xf32>
    %223 = arith.subf %215, %222 : vector<16x16xf32>
    %cst_77 = arith.constant 0.000000e+00 : f32
    %224 = vector.broadcast %cst_77 : f32 to vector<16x16xf32>
    %225 = arith.minimumf %223, %224 : vector<16x16xf32>
    %226 = math.exp %225 : vector<16x16xf32>
    %227 = arith.mulf %226, %1 : vector<16x16xf32>
    %cst_78 = arith.constant dense<0.000000e+00> : vector<16xf32>
    %228 = vector.multi_reduction <add>, %227, %cst_78 [1] : vector<16x16xf32> to vector<16xf32>
    %229 = vector.shape_cast %228 : vector<16xf32> to vector<16x1xf32>
    %cst_79 = arith.constant 0.000000e+00 : f32
    %230 = vector.broadcast %cst_79 : f32 to vector<16x1xf32>
    %231 = arith.cmpf ogt, %229, %230 : vector<16x1xf32>
    %232 = tpu.reciprocal %229 {approx = true} : vector<16x1xf32> -> vector<16x1xf32>
    %cst_80 = arith.constant 0.000000e+00 : f32
    %233 = vector.broadcast %cst_80 : f32 to vector<16x1xf32>
    %234 = arith.select %231, %232, %233 : vector<16x1xi1>, vector<16x1xf32>
    %235 = arith.truncf %227 : vector<16x16xf32> to vector<16x16xbf16>
    %cst_81 = arith.constant dense<0.000000e+00> : vector<16x8xf32>
    %236 = tpu.matmul %235, %207, %cst_81 {dimension_numbers = #tpu.dot_dimension_numbers<[1], [0], [0], [1], [0, 0, 1, 1], [], []>} : vector<16x16xbf16>, vector<16x8xbf16>, vector<16x8xf32> -> vector<16x8xf32>
    %237 = vector.broadcast %234 : vector<16x1xf32> to vector<16x8xf32>
    %238 = arith.mulf %236, %237 : vector<16x8xf32>
    %239 = arith.addf %238, %206 : vector<16x8xf32>
    %cst_82 = arith.constant 0.000000e+00 : f32
    %240 = vector.broadcast %cst_82 : f32 to vector<16x8xf32>
    %241 = arith.cmpf ogt, %239, %240 : vector<16x8xf32>
    %cst_83 = arith.constant 0.000000e+00 : f32
    %242 = vector.broadcast %cst_83 : f32 to vector<16x8xf32>
    %243 = arith.minimumf %239, %242 : vector<16x8xf32>
    %244 = math.exp %243 : vector<16x8xf32>
    %cst_84 = arith.constant 1.000000e+00 : f32
    %245 = vector.broadcast %cst_84 : f32 to vector<16x8xf32>
    %246 = arith.subf %244, %245 : vector<16x8xf32>
    %247 = arith.select %241, %239, %246 : vector<16x8xi1>, vector<16x8xf32>
    %248 = arith.truncf %247 : vector<16x8xf32> to vector<16x8xbf16>
    %c0_85 = arith.constant 0 : index
    %c0_86 = arith.constant 0 : index
    %249 = vector.load %arg8[%c0_85, %c0_86] : memref<8x8xbf16, #tpu.memory_space<vmem>>, vector<8x8xbf16>
    %cst_87 = arith.constant dense<0.000000e+00> : vector<16x8xf32>
    %250 = tpu.matmul %248, %249, %cst_87 {dimension_numbers = #tpu.dot_dimension_numbers<[1], [0], [0], [1], [0, 0, 1, 1], [], []>} : vector<16x8xbf16>, vector<8x8xbf16>, vector<16x8xf32> -> vector<16x8xf32>
    %c0_88 = arith.constant 0 : index
    %c0_89 = arith.constant 0 : index
    %251 = vector.load %arg9[%c0_88, %c0_89] : memref<16x8xf32, #tpu.memory_space<vmem>>, vector<16x8xf32>
    tpu.vector_store %arg9[%c0_88, %c0_89], %250 {strides = array<i32>} : memref<16x8xf32, #tpu.memory_space<vmem>>, vector<16x8xf32>,
    return
  }
}

</mosaic_0001>

<bundles_post_ra>
// kernel: tpu_custom_call.1
= control target key start
LH: loop header
LB: loop body
LE: loop exit
PB: predicated region body
PF: predicated region fallthrough
CT: control target
= control target key end

     0   :  { %14 = vsyncpa [#allocation3], 0  ;;  %s1394_s30 = smov [#allocation2]   ;;  %s1654_s0 = inlined_call_operand.vmem [shape: bf16[16,16], index: 0, kind: input, shape index: {}]   ;;  %s1655_s1 = inlined_call_operand.vmem [shape: f32[16,32], index: 1, kind: input, shape index: {}]   ;;  %s1656_s2 = inlined_call_operand.vmem [shape: bf16[32,16], index: 2, kind: input, shape index: {}]   ;;  %s1657_s3 = inlined_call_operand.vmem [shape: bf16[16,20], index: 3, kind: input, shape index: {}]   ;;  %s1658_s4 = inlined_call_operand.vmem [shape: bf16[16,20], index: 4, kind: input, shape index: {}]   ;;  %s1659_s5 = inlined_call_operand.hbm [shape: bf16[16,16], index: 5, kind: input, shape index: {}]   ;;  %s1660_s6 = inlined_call_operand.vmem [shape: bf16[16,10], index: 6, kind: input, shape index: {}]   ;;  %s1661_s7 = inlined_call_operand.vmem [shape: bf16[16,8], index: 7, kind: input, shape index: {}]   ;;  %s1662_s8 = inlined_call_operand.vmem [shape: bf16[8,8], index: 8, kind: input, shape index: {}]   ;;  %s1663_s9 = inlined_call_operand.vmem [shape: f32[16,8], index: 9, kind: output, shape index: {}]  }
   0x1   :  { %s30_s10 = sshll.u32 %s1394_s30, 4  ;;  %s1370_s13 = scalar_lea.hbm %s1659_s5, 128  ;;  %s31_s10 = int_to_ptr.vmem [resolvable:$true] %s30_s10 }
   0x2   :  { %p1371_p0 = scmp.ne.s32.totalorder %s1659_s5, %s1370_s13  ;;  %p1374_p1 = scmp.lt.u32.totalorder %s1370_s13, %s1659_s5 }
   0x4   :  { %p1376_p2 = pnand %p1374_p1, %p1371_p0 }
   0x6   :  { %1379 = shalt.err (!%p1376_p2)
}
   0x7   :  { %s1380_s18 = scalar_lea.vmem %s31_s10, 128  ;;  %p1385_p4 = scmp.lt.s32.totalorder %s31_s10, %s31_s10 }
   0x8   :  { %p1381_p3 = scmp.ne.s32.totalorder %s31_s10, %s1380_s18  ;;  %p1386_p5 = scmp.lt.s32.totalorder %s1380_s18, %s1380_s18 }
   0xa   :  { %p1387_p6 = por %p1386_p5, %p1385_p4 }
   0xc   :  { %p1388_p7 = pnand %p1387_p6, %p1381_p3 }
   0xe   :  { %1391 = shalt.err (!%p1388_p7)
}
   0xf   :  { %s1395_s19 = smov 64   ;;  %s1396_s20 = smov 4  }
  0x10   :  { %36 = dma.hbm_to_vmem [thread:$0]  %s1659_s5, 128, %s31_s10, [#allocation3], %s1395_s19, %s1395_s19, %s1396_s20  }
  0x11   :  { %1392 = dma.done.wait [#allocation3], 128  }
  0x12   :  { %1393 = vsyncadd [#allocation3], 4294967168  ;;  %v1397_v0 = vmov 0.0   ;;  %vm1398_vm0 = vmmov 0   ;;  %v1303_v1 = vld [vmem:[%s1656_s2] sm:$0xff]   ;;  %v1304_v2 = vld [vmem:[%s1656_s2 + $0x8] sm:$0xff]   ;;  %v218_v22 = vlaneseq }
  0x13   :  { %1201 = vmatprep.subr.bf16.mxu0 %v1397_v0  ;;  %1205 = vmatprep.mubr.msk.bf16.mxu0 %vm1398_vm0, %v1397_v0  ;;  %v51_v3 = vld [vmem:[%s1655_s1] sm:$0xff]  ;;  %v52_v4 = vld [vmem:[%s1655_s1 + $0x8] sm:$0xff]  ;;  %vm70_vm1 = vcmask 261120   ;;  %v1399_v7 = vmov 19   ;;  %vm124_vm2 = vcmask 130048   ;;  %s1400_s1 = smov 112  }
  0x14   :  { %1209 = vmatprep.subr.bf16.mxu1 %v1397_v0  ;;  %1211 = vmatprep.mubr.msk.bf16.mxu1 %vm1398_vm0, %v1397_v0  ;;  %v53_v5 = vpack.c.bf16 %v52_v4, %v51_v3  ;;  %v1305_v6 = vld [vmem:[%s1657_s3] sm:$0xff]   ;;  %v1401_v18 = vmov 18   ;;  %v1500_v24 = vshrl.u32 %v218_v22, 7  ;;  %vm442_vm15 = vcmask 64512  }
  0x15   :  { %1202 = vmatpush3.bf16.msra.mxu0 %v1303_v1  ;;  %1210 = vmatpush3.bf16.msra.mxu1 %v1305_v6  ;;  %v1173_v28 = vld [vmem:[%s1654_s0] sm:$0xff]   ;;  %s1402_s0 = smov 120  }
  0x16   :  { %1203 = vmatprep.subr.bf16.mxu0 %v1397_v0  ;;  %1215 = vmatprep.subr.bf16.mxu1 %v1397_v0  ;;  %v1503_v26 = vsub.s32 0, %v1500_v24  ;;  %v331_v27 = vsub.s32 1, %v1500_v24  ;;  %v1509_v30 = vunpack.c.h.bf16 %v1173_v28  ;;  %v1511_v31 = vunpack.c.l.bf16 %v1173_v28 }
  0x17   :  { %1286 = vset.pattern.permute.xlu1 %v1399_v7 }
  0x18   :  { %vm231_vm3 = vcmp.gt.f32.partialorder %v1509_v30, 0.0  ;;  %vm230_vm4 = vcmp.gt.f32.partialorder %v1511_v31, 0.0 }
  0x19   :  { %1204 = vmatpush3.bf16.msra.mxu0 %v1304_v2 }
  0x1a   :  { %1221 = vmatprep.subr.bf16.mxu0 %v1397_v0 }
  0x1c   :  { %1206 = vmatmul.mubr.msk.bf16.vlgmr.msra.gmra.mrb[0].mxu0 %vm70_vm1, %v53_v5 }
  0x1d   :  { %1223 = vmatprep.mubr.msk.bf16.mxu0 %vm1398_vm0, %v1397_v0 }
  0xef   :  { %v108_v8 = vpop.f32.mrb[0].mxu0 }
  0xf0   :  { %v1207_v9 = vpop.f32.mrb[1].mxu0 }
  0xf1   :  { %v111_v10 = vpop.f32.mrb[2].mxu0 }
  0xf2   :  { %v115_v11 = vpack.c.bf16 %v111_v10, %v108_v8  ;;  %v1208_v12 = vpop.f32.mrb[3].mxu0 }
  0xf4   :  { %1212 = vmatmul.mubr.msk.bf16.vlgmr.msra.gmra.mrb[0].mxu1 %vm124_vm2, %v115_v11 }
  0xf5   :  { %1217 = vmatprep.mubr.msk.bf16.mxu1 %vm1398_vm0, %v1397_v0 }
 0x1c7   :  { %v162_v13 = vpop.f32.mrb[0].mxu1 }
 0x1c8   :  { %322 = vperm.xlu1 %1286, %v162_v13   ;;  %171 = vrot.lane.b32.xlu0 %v162_v13, %s1400_s1  ;;  %v1213_v14 = vpop.f32.mrb[1].mxu1 }
 0x1c9   :  { %v165_v15 = vpop.f32.mrb[2].mxu1 }
 0x1ca   :  { %v209_v16 = vpack.c.bf16 %v165_v15, %v162_v13  ;;  %v1214_v17 = vpop.f32.mrb[3].mxu1 }
 0x1cc   :  { %326 = vperm.xlu1 %1286, %v165_v15   ;;  %173 = vrot.lane.b32.xlu0 %v165_v15, %s1400_s1 }
 0x1cd   :  { %1216 = vmatpush3.bf16.msra.mxu1 %v209_v16 }
 0x1ce   :  { %1227 = vmatprep.subr.bf16.mxu1 %v1397_v0 }
 0x1d0   :  { %1287 = vset.pattern.permute.xlu1 %v1401_v18 }
 0x1d1   :  { %211 = vperm.xlu1 %1287, %v162_v13  }
 0x1d5   :  { %215 = vperm.xlu1 %1287, %v165_v15  }
 0x1d9   :  { %1293 = vset.pattern.permute.xlu1 %v1399_v7 }
 0x23a   :  { %v172_v19 = vpop.permute.xlu0 %171 }
 0x23b   :  { %177 = vxpose.xlu0.b32.start [1/2] (short) (narrow) %v172_v19, 8 }
 0x23e   :  { %v174_v20 = vpop.permute.xlu0 %173 }
 0x23f   :  { %178 = vxpose.xlu0.b32.end [2/2] (short) (narrow) %v174_v20, 8 }
 0x247   :  { %v323_v21 = vpop.permute.xlu1 %322 }
 0x24b   :  { %v327_v23 = vpop.permute.xlu1 %326 }
 0x250   :  { %v212_v25 = vpop.permute.xlu1 %211 }
 0x254   :  { %v216_v34 = vpop.permute.xlu1 %215 }
 0x268   :  { %1294 = vset.pattern.permute.xlu0 %v1399_v7 }
 0x2bb   :  { %v193_v29 = vpop.trf.xlu0 }
 0x2bc   :  { %v221_v32 = vrot.slane %v193_v29, %v1503_v26  ;;  %v332_v33 = vrot.slane %v193_v29, %v331_v27 }
 0x2be   :  { %v223_v35 = vadd.f32 %v221_v32, %v216_v34  ;;  %v333_v36 = vadd.f32 %v332_v33, %v323_v21  ;;  %v334_v37 = vadd.f32 %v332_v33, %v327_v23  ;;  %v222_v50 = vadd.f32 %v221_v32, %v212_v25  ;;  %v1306_v25 = vld [vmem:[%s1658_s4] sm:$0xff]   ;;  %s1403_s4 = smov 8  }
 0x2c0   :  { %vm336_vm5 = vcmp.gt.f32.partialorder %v334_v37, 0.0  ;;  %v338_v38 = vmul.f32 0.2, %v334_v37  ;;  %vm335_vm6 = vcmp.gt.f32.partialorder %v333_v36, 0.0  ;;  %v337_v39 = vmul.f32 0.2, %v333_v36 }
 0x2c1   :  { %vm225_vm7 = vcmp.gt.f32.partialorder %v223_v35, 0.0  ;;  %v227_v40 = vmul.f32 0.2, %v223_v35  ;;  %v226_v51 = vmul.f32 0.2, %v222_v50  ;;  %vm224_vm8 = vcmp.gt.f32.partialorder %v222_v50, 0.0 }
 0x2c2   :  { %v340_v41 = vsel %vm336_vm5, %v334_v37, %v338_v38  ;;  %v339_v42 = vsel %vm335_vm6, %v333_v36, %v337_v39 }
 0x2c3   :  { %v342_v43 = vsel %vm231_vm3, %v340_v41, -1e+09  ;;  %v341_v44 = vsel %vm230_vm4, %v339_v42, -1e+09  ;;  %v229_v45 = vsel %vm225_vm7, %v223_v35, %v227_v40  ;;  %v228_v52 = vsel %vm224_vm8, %v222_v50, %v226_v51 }
 0x2c4   :  { %v346_v46 = vsel %vm124_vm2, %v342_v43, -inf  ;;  %v343_v47 = vsel %vm124_vm2, %v341_v44, -inf  ;;  %v233_v48 = vsel %vm231_vm3, %v229_v45, -1e+09  ;;  %v232_v53 = vsel %vm230_vm4, %v228_v52, -1e+09 }
 0x2c5   :  { %347 = vmax.xlane.f32.xlu0 %v346_v46  ;;  %344 = vmax.xlane.f32.xlu1 %v343_v47  ;;  %v237_v49 = vsel %vm124_vm2, %v233_v48, -inf  ;;  %v234_v54 = vsel %vm124_vm2, %v232_v53, -inf  ;;  %v1307_v46 = vld [vmem:[#allocation2] sm:$0xff]  }
 0x2c9   :  { %238 = vmax.xlane.f32.xlu0 %v237_v49 }
 0x2d6   :  { %373 = vrot.lane.b32.xlu1 %v209_v16, %s1402_s0 }
 0x2fa   :  { %235 = vmax.xlane.f32.xlu1 %v234_v54 }
 0x352   :  { %v348_v55 = vpop.xlane.xlu0 %347  ;;  %v345_v56 = vpop.xlane.xlu1 %344 }
 0x353   :  { %v350_v57 = vsub.f32 %v340_v41, %v348_v55  ;;  %v349_v58 = vsub.f32 %v339_v42, %v345_v56 }
 0x355   :  { %v352_v59 = vmin.f32 %v350_v57, 0.0  ;;  %v351_v60 = vmin.f32 %v349_v58, 0.0 }
 0x356   :  { %v374_v61 = vpop.permute.xlu1 %373  ;;  %v239_v8 = vpop.xlane.xlu0 %238 }
 0x357   :  { %v355_v62 = vmul.f32 1.442695, %v352_v59  ;;  %v353_v63 = vmul.f32 1.442695, %v351_v60  ;;  %1222 = vmatpush3.bf16.msra.mxu0 %v374_v61  ;;  %v241_v9 = vsub.f32 %v229_v45, %v239_v8 }
 0x358   :  { %1233 = vmatprep.subr.bf16.mxu0 %v1397_v0 }
 0x359   :  { %1310 = vpow2.f32 %v355_v62  ;;  %v243_v10 = vmin.f32 %v241_v9, 0.0 }
 0x35a   :  { %1312 = vpow2.f32 %v353_v63 }
 0x35b   :  { %v246_v12 = vmul.f32 1.442695, %v243_v10 }
 0x35d   :  { %1314 = vpow2.f32 %v246_v12 }
 0x363   :  { %v1311_v1 = vpop.eup %1310 }
 0x364   :  { %v1313_v2 = vpop.eup %1312  ;;  %v358_v3 = vmul.f32 %v1311_v1, %v1509_v30 }
 0x365   :  { %v357_v4 = vmul.f32 %v1313_v2, %v1511_v31 }
 0x366   :  { %v362_v7 = vsel %vm124_vm2, %v358_v3, 0.0 }
 0x367   :  { %v359_v5 = vsel %vm124_vm2, %v357_v4, 0.0  ;;  %v371_v6 = vpack.c.bf16 %v358_v3, %v357_v4  ;;  %v1315_v16 = vpop.eup %1314 }
 0x368   :  { %360 = vadd.xlane.f32.xlu0 %v359_v5  ;;  %v249_v20 = vmul.f32 %v1315_v16, %v1509_v30 }
 0x369   :  { %1224 = vmatmul.mubr.msk.bf16.vlgmr.msra.gmra.mrb[4].mxu0 %vm124_vm2, %v371_v6 }
 0x36a   :  { %1235 = vmatprep.mubr.msk.bf16.mxu0 %vm1398_vm0, %v1397_v0  ;;  %v253_v23 = vsel %vm124_vm2, %v249_v20, 0.0  ;;  %1234 = vmatpush3.bf16.msra.mxu0 %v1307_v46 }
 0x36b   :  { %1245 = vmatprep.subr.bf16.mxu0 %v1397_v0 }
 0x36c   :  { %363 = vadd.xlane.f32.xlu0 %v362_v7 }
 0x387   :  { %v236_v11 = vpop.xlane.xlu1 %235 }
 0x388   :  { %v240_v13 = vsub.f32 %v228_v52, %v236_v11 }
 0x38a   :  { %v242_v14 = vmin.f32 %v240_v13, 0.0 }
 0x38c   :  { %v244_v15 = vmul.f32 1.442695, %v242_v14 }
 0x38e   :  { %1316 = vpow2.f32 %v244_v15 }
 0x398   :  { %v1317_v17 = vpop.eup %1316 }
 0x399   :  { %v248_v19 = vmul.f32 %v1317_v17, %v1511_v31 }
 0x39b   :  { %v250_v21 = vsel %vm124_vm2, %v248_v19, 0.0  ;;  %v262_v22 = vpack.c.bf16 %v249_v20, %v248_v19 }
 0x39c   :  { %251 = vadd.xlane.f32.xlu0 %v250_v21 }
 0x39d   :  { %1218 = vmatmul.mubr.msk.bf16.vlgmr.msra.gmra.mrb[4].mxu1 %vm124_vm2, %v262_v22 }
 0x39e   :  { %1229 = vmatprep.mubr.msk.bf16.mxu1 %vm1398_vm0, %v1397_v0  ;;  %1228 = vmatpush3.bf16.msra.mxu1 %v1306_v25 }
 0x39f   :  { %1239 = vmatprep.subr.bf16.mxu1 %v1397_v0 }
 0x3a0   :  { %254 = vadd.xlane.f32.xlu0 %v253_v23 }
 0x3f5   :  { %v361_v28 = vpop.xlane.xlu0 %360 }
 0x3f6   :  { %1318 = vrcp.f32 %v361_v28  ;;  %vm365_vm9 = vcmp.gt.f32.partialorder %v361_v28, 0.0 }
 0x3f9   :  { %v364_v29 = vpop.xlane.xlu0 %363 }
 0x3fa   :  { %1320 = vrcp.f32 %v364_v29  ;;  %vm366_vm10 = vcmp.gt.f32.partialorder %v364_v29, 0.0 }
 0x400   :  { %v1319_v32 = vpop.eup %1318 }
 0x401   :  { %v369_v34 = vsel %vm365_vm9, %v1319_v32, 0.0 }
 0x404   :  { %v1321_v33 = vpop.eup %1320 }
 0x405   :  { %v370_v38 = vsel %vm366_vm10, %v1321_v33, 0.0 }
 0x429   :  { %v252_v58 = vpop.xlane.xlu0 %251 }
 0x42a   :  { %vm256_vm13 = vcmp.gt.f32.partialorder %v252_v58, 0.0 }
 0x42d   :  { %v255_v59 = vpop.xlane.xlu0 %254 }
 0x42e   :  { %vm257_vm14 = vcmp.gt.f32.partialorder %v255_v59, 0.0 }
 0x43c   :  { %v413_v35 = vpop.f32.mrb[4].mxu0 }
 0x43d   :  { %v420_v36 = vmul.f32 %v413_v35, %v369_v34  ;;  %v1225_v37 = vpop.f32.mrb[5].mxu0 }
 0x43e   :  { %v416_v39 = vpop.f32.mrb[6].mxu0 }
 0x43f   :  { %v424_v40 = vmin.f32 %v420_v36, 0.0  ;;  %v421_v41 = vmul.f32 %v416_v39, %v370_v38  ;;  %v1226_v42 = vpop.f32.mrb[7].mxu0  ;;  %vm422_vm11 = vcmp.gt.f32.partialorder %v420_v36, 0.0 }
 0x441   :  { %v426_v43 = vmul.f32 1.442695, %v424_v40  ;;  %v425_v44 = vmin.f32 %v421_v41, 0.0  ;;  %vm423_vm12 = vcmp.gt.f32.partialorder %v421_v41, 0.0 }
 0x443   :  { %1322 = vpow2.f32 %v426_v43  ;;  %v428_v45 = vmul.f32 1.442695, %v425_v44 }
 0x445   :  { %1324 = vpow2.f32 %v428_v45 }
 0x446   :  { %1326 = vrcp.f32 %v252_v58 }
 0x447   :  { %1328 = vrcp.f32 %v255_v59 }
 0x44d   :  { %v1323_v47 = vpop.eup %1322 }
 0x44e   :  { %v1152_v48 = vadd.f32 -1.0, %v1323_v47 }
 0x44f   :  { %v1325_v49 = vpop.eup %1324 }
 0x450   :  { %v1153_v50 = vadd.f32 -1.0, %v1325_v49  ;;  %v432_v51 = vsel %vm422_vm11, %v420_v36, %v1152_v48  ;;  %v1327_v60 = vpop.eup %1326 }
 0x451   :  { %v1329_v61 = vpop.eup %1328  ;;  %v260_v62 = vsel %vm256_vm13, %v1327_v60, 0.0 }
 0x452   :  { %v433_v52 = vsel %vm423_vm12, %v421_v41, %v1153_v50  ;;  %v261_v1 = vsel %vm257_vm14, %v1329_v61, 0.0 }
 0x453   :  { %v1288_v53 = vpack.i.bf16 %v433_v52, %v432_v51 }
 0x455   :  { %1289 = vrot.lane.b32.xlu1 %v1288_v53, %s1403_s4 }
 0x470   :  { %v300_v54 = vpop.f32.mrb[4].mxu1 }
 0x471   :  { %v1219_v55 = vpop.f32.mrb[5].mxu1  ;;  %v307_v63 = vmul.f32 %v300_v54, %v260_v62 }
 0x472   :  { %v303_v56 = vpop.f32.mrb[6].mxu1 }
 0x473   :  { %v1220_v57 = vpop.f32.mrb[7].mxu1  ;;  %v308_v2 = vmul.f32 %v303_v56, %v261_v1  ;;  %v311_v3 = vmin.f32 %v307_v63, 0.0  ;;  %vm309_vm1 = vcmp.gt.f32.partialorder %v307_v63, 0.0 }
 0x475   :  { %v312_v4 = vmin.f32 %v308_v2, 0.0  ;;  %v313_v5 = vmul.f32 1.442695, %v311_v3  ;;  %vm310_vm5 = vcmp.gt.f32.partialorder %v308_v2, 0.0 }
 0x477   :  { %v315_v6 = vmul.f32 1.442695, %v312_v4  ;;  %1330 = vpow2.f32 %v313_v5 }
 0x479   :  { %1332 = vpow2.f32 %v315_v6 }
 0x481   :  { %v1331_v7 = vpop.eup %1330 }
 0x482   :  { %v1149_v9 = vadd.f32 -1.0, %v1331_v7 }
 0x483   :  { %v1333_v8 = vpop.eup %1332 }
 0x484   :  { %v1150_v10 = vadd.f32 -1.0, %v1333_v8  ;;  %v319_v14 = vsel %vm309_vm1, %v307_v63, %v1149_v9 }
 0x486   :  { %v320_v15 = vsel %vm310_vm5, %v308_v2, %v1150_v10 }
 0x4c7   :  { %v1290_v11 = vpop.permute.xlu1 %1289 }
 0x4c8   :  { %v1292_v12 = vunpack.i.h.bf16 %v1290_v11  ;;  %v1291_v13 = vunpack.i.l.bf16 %v1290_v11 }
 0x4ca   :  { %v444_v16 = vsel %vm442_vm15, %v320_v15, %v1292_v12  ;;  %v443_v17 = vsel %vm442_vm15, %v319_v14, %v1291_v13 }
 0x4cb   :  { %v445_v19 = vpack.c.bf16 %v444_v16, %v443_v17 }
 0x4cd   :  { %1230 = vmatmul.mubr.msk.bf16.vlgmr.msra.gmra.mrb[8].mxu1 %vm124_vm2, %v445_v19  ;;  %1236 = vmatmul.mubr.msk.bf16.vlgmr.msra.gmra.mrb[8].mxu0 %vm124_vm2, %v445_v19 }
 0x4ce   :  { %1247 = vmatprep.mubr.msk.bf16.mxu0 %vm1398_vm0, %v1397_v0  ;;  %1241 = vmatprep.mubr.msk.bf16.mxu1 %vm1398_vm0, %v1397_v0 }
 0x5a0   :  { %v491_v20 = vpop.f32.mrb[8].mxu1  ;;  %v1560_v21 = vpop.f32.mrb[8].mxu0 }
 0x5a1   :  { %v1237_v22 = vpop.f32.mrb[9].mxu0  ;;  %500 = vrot.lane.b32.xlu0 %v491_v20, %s1400_s1  ;;  %v1231_v23 = vpop.f32.mrb[9].mxu1 }
 0x5a2   :  { %v494_v25 = vpop.f32.mrb[10].mxu1  ;;  %v1563_v28 = vpop.f32.mrb[10].mxu0 }
 0x5a3   :  { %v587_v29 = vpack.c.bf16 %v494_v25, %v491_v20  ;;  %v1238_v32 = vpop.f32.mrb[11].mxu0  ;;  %502 = vrot.lane.b32.xlu1 %v494_v25, %s1400_s1  ;;  %v1232_v33 = vpop.f32.mrb[11].mxu1 }
 0x5a5   :  { %704 = vperm.xlu0 %1294, %v494_v25   ;;  %1240 = vmatpush3.bf16.msra.mxu1 %v587_v29 }
 0x5a6   :  { %1251 = vmatprep.subr.bf16.mxu1 %v1397_v0 }
 0x5a7   :  { %700 = vperm.xlu1 %1293, %v491_v20  }
 0x5a9   :  { %1295 = vset.pattern.permute.xlu0 %v1401_v18 }
 0x5aa   :  { %589 = vperm.xlu0 %1295, %v491_v20  }
 0x5ae   :  { %593 = vperm.xlu0 %1295, %v494_v25  }
 0x613   :  { %v501_v34 = vpop.permute.xlu0 %500 }
 0x614   :  { %506 = vxpose.xlu1.b32.start [1/2] (short) (narrow) %v501_v34, 8 }
 0x615   :  { %v503_v35 = vpop.permute.xlu1 %502 }
 0x618   :  { %507 = vxpose.xlu1.b32.end [2/2] (short) (narrow) %v503_v35, 8 }
 0x624   :  { %v705_v36 = vpop.permute.xlu0 %704 }
 0x626   :  { %v701_v37 = vpop.permute.xlu1 %700 }
 0x629   :  { %v590_v38 = vpop.permute.xlu0 %589 }
 0x62d   :  { %v594_v42 = vpop.permute.xlu0 %593 }
 0x694   :  { %v522_v39 = vpop.trf.xlu1 }
 0x695   :  { %v599_v40 = vrot.slane %v522_v39, %v1503_v26  ;;  %v710_v41 = vrot.slane %v522_v39, %v331_v27 }
 0x697   :  { %v601_v43 = vadd.f32 %v599_v40, %v594_v42  ;;  %v711_v44 = vadd.f32 %v710_v41, %v701_v37  ;;  %v712_v45 = vadd.f32 %v710_v41, %v705_v36  ;;  %v600_v55 = vadd.f32 %v599_v40, %v590_v38  ;;  %v1308_v36 = vld [vmem:[%s1660_s6] sm:$0xff]  }
 0x699   :  { %vm714_vm6 = vcmp.gt.f32.partialorder %v712_v45, 0.0  ;;  %v716_v18 = vmul.f32 0.2, %v712_v45  ;;  %vm713_vm7 = vcmp.gt.f32.partialorder %v711_v44, 0.0  ;;  %v715_v46 = vmul.f32 0.2, %v711_v44 }
 0x69a   :  { %vm603_vm8 = vcmp.gt.f32.partialorder %v601_v43, 0.0  ;;  %v605_v47 = vmul.f32 0.2, %v601_v43  ;;  %v604_v56 = vmul.f32 0.2, %v600_v55  ;;  %vm602_vm9 = vcmp.gt.f32.partialorder %v600_v55, 0.0 }
 0x69b   :  { %v718_v48 = vsel %vm714_vm6, %v712_v45, %v716_v18  ;;  %v717_v49 = vsel %vm713_vm7, %v711_v44, %v715_v46 }
 0x69c   :  { %v720_v50 = vsel %vm231_vm3, %v718_v48, -1e+09  ;;  %v719_v51 = vsel %vm230_vm4, %v717_v49, -1e+09  ;;  %v607_v24 = vsel %vm603_vm8, %v601_v43, %v605_v47  ;;  %v606_v57 = vsel %vm602_vm9, %v600_v55, %v604_v56 }
 0x69d   :  { %v724_v27 = vsel %vm124_vm2, %v720_v50, -inf  ;;  %v721_v52 = vsel %vm124_vm2, %v719_v51, -inf  ;;  %v609_v53 = vsel %vm231_vm3, %v607_v24, -1e+09  ;;  %v608_v58 = vsel %vm230_vm4, %v606_v57, -1e+09 }
 0x69e   :  { %725 = vmax.xlane.f32.xlu1 %v724_v27  ;;  %722 = vmax.xlane.f32.xlu0 %v721_v52  ;;  %v613_v54 = vsel %vm124_vm2, %v609_v53, -inf  ;;  %v610_v59 = vsel %vm124_vm2, %v608_v58, -inf }
 0x6a2   :  { %614 = vmax.xlane.f32.xlu1 %v613_v54  ;;  %v1309_v54 = vld [vmem:[%s1661_s7] sm:$0xff]  }
 0x6b4   :  { %751 = vrot.lane.b32.xlu0 %v587_v29, %s1402_s0 }
 0x6d3   :  { %611 = vmax.xlane.f32.xlu0 %v610_v59 }
 0x6e9   :  { %804 = vrot.lane.b32.xlu0 %v1563_v28, %s1402_s0 }
 0x72b   :  { %v726_v60 = vpop.xlane.xlu1 %725  ;;  %v723_v61 = vpop.xlane.xlu0 %722 }
 0x72c   :  { %v728_v62 = vsub.f32 %v718_v48, %v726_v60  ;;  %v727_v63 = vsub.f32 %v717_v49, %v723_v61 }
 0x72e   :  { %v730_v1 = vmin.f32 %v728_v62, 0.0  ;;  %v729_v2 = vmin.f32 %v727_v63, 0.0 }
 0x72f   :  { %v615_v3 = vpop.xlane.xlu1 %614  ;;  %v752_v4 = vpop.permute.xlu0 %751 }
 0x730   :  { %v733_v5 = vmul.f32 1.442695, %v730_v1  ;;  %v731_v6 = vmul.f32 1.442695, %v729_v2  ;;  %v617_v7 = vsub.f32 %v607_v24, %v615_v3  ;;  %1246 = vmatpush3.bf16.msra.mxu0 %v752_v4 }
 0x731   :  { %1257 = vmatprep.subr.bf16.mxu0 %v1397_v0 }
 0x732   :  { %1334 = vpow2.f32 %v733_v5  ;;  %v619_v8 = vmin.f32 %v617_v7, 0.0 }
 0x733   :  { %1336 = vpow2.f32 %v731_v6 }
 0x734   :  { %v622_v9 = vmul.f32 1.442695, %v619_v8 }
 0x736   :  { %1338 = vpow2.f32 %v622_v9 }
 0x73c   :  { %v1335_v10 = vpop.eup %1334 }
 0x73d   :  { %v1337_v11 = vpop.eup %1336  ;;  %v736_v12 = vmul.f32 %v1335_v10, %v1509_v30 }
 0x73e   :  { %v735_v13 = vmul.f32 %v1337_v11, %v1511_v31 }
 0x73f   :  { %v740_v20 = vsel %vm124_vm2, %v736_v12, 0.0 }
 0x740   :  { %v1339_v14 = vpop.eup %1338  ;;  %v737_v15 = vsel %vm124_vm2, %v735_v13, 0.0  ;;  %v749_v16 = vpack.c.bf16 %v736_v12, %v735_v13 }
 0x741   :  { %738 = vadd.xlane.f32.xlu1 %v737_v15  ;;  %v625_v17 = vmul.f32 %v1339_v14, %v1509_v30 }
 0x742   :  { %1248 = vmatmul.mubr.msk.bf16.vlgmr.msra.gmra.mrb[12].mxu0 %vm124_vm2, %v749_v16 }
 0x743   :  { %v629_v19 = vsel %vm124_vm2, %v625_v17, 0.0  ;;  %1259 = vmatprep.mubr.msk.bf16.mxu0 %vm1398_vm0, %v1397_v0  ;;  %1258 = vmatpush3.bf16.msra.mxu0 %v1309_v54 }
 0x744   :  { %630 = vadd.xlane.f32.xlu0 %v629_v19  ;;  %1269 = vmatprep.subr.bf16.mxu0 %v1397_v0 }
 0x745   :  { %741 = vadd.xlane.f32.xlu1 %v740_v20 }
 0x756   :  { %802 = vrot.lane.b32.xlu1 %v1560_v21, %s1402_s0 }
 0x760   :  { %v612_v22 = vpop.xlane.xlu0 %611 }
 0x761   :  { %v616_v23 = vsub.f32 %v606_v57, %v612_v22 }
 0x763   :  { %v618_v25 = vmin.f32 %v616_v23, 0.0 }
 0x764   :  { %v805_v50 = vpop.permute.xlu0 %804 }
 0x765   :  { %v620_v29 = vmul.f32 1.442695, %v618_v25 }
 0x767   :  { %1340 = vpow2.f32 %v620_v29 }
 0x771   :  { %v1341_v32 = vpop.eup %1340 }
 0x772   :  { %v624_v33 = vmul.f32 %v1341_v32, %v1511_v31 }
 0x774   :  { %v638_v34 = vpack.c.bf16 %v625_v17, %v624_v33  ;;  %v626_v35 = vsel %vm124_vm2, %v624_v33, 0.0 }
 0x776   :  { %1242 = vmatmul.mubr.msk.bf16.vlgmr.msra.gmra.mrb[12].mxu1 %vm124_vm2, %v638_v34 }
 0x777   :  { %1253 = vmatprep.mubr.msk.bf16.mxu1 %vm1398_vm0, %v1397_v0  ;;  %1252 = vmatpush3.bf16.msra.mxu1 %v1308_v36 }
 0x778   :  { %1263 = vmatprep.subr.bf16.mxu1 %v1397_v0 }
 0x77a   :  { %627 = vadd.xlane.f32.xlu1 %v626_v35  ;;  %v1404_v35 = vmov 9  }
 0x77b   :  { %1301 = vset.pattern.permute.xlu1 %v1404_v35 }
 0x7ce   :  { %v739_v37 = vpop.xlane.xlu1 %738 }
 0x7cf   :  { %1342 = vrcp.f32 %v739_v37  ;;  %vm743_vm10 = vcmp.gt.f32.partialorder %v739_v37, 0.0 }
 0x7d1   :  { %v631_v63 = vpop.xlane.xlu0 %630 }
 0x7d2   :  { %v742_v38 = vpop.xlane.xlu1 %741  ;;  %vm633_vm1 = vcmp.gt.f32.partialorder %v631_v63, 0.0 }
 0x7d3   :  { %1344 = vrcp.f32 %v742_v38  ;;  %vm744_vm11 = vcmp.gt.f32.partialorder %v742_v38, 0.0 }
 0x7d6   :  { %v803_v45 = vpop.permute.xlu1 %802 }
 0x7d9   :  { %v1343_v39 = vpop.eup %1342 }
 0x7da   :  { %v747_v41 = vsel %vm743_vm10, %v1343_v39, 0.0 }
 0x7dd   :  { %v1345_v40 = vpop.eup %1344 }
 0x7de   :  { %v748_v18 = vsel %vm744_vm11, %v1345_v40, 0.0 }
 0x807   :  { %v628_v62 = vpop.xlane.xlu1 %627 }
 0x808   :  { %vm632_vm14 = vcmp.gt.f32.partialorder %v628_v62, 0.0 }
 0x815   :  { %v791_v42 = vpop.f32.mrb[12].mxu0 }
 0x816   :  { %v798_v43 = vmul.f32 %v791_v42, %v747_v41  ;;  %v1249_v44 = vpop.f32.mrb[13].mxu0 }
 0x817   :  { %v794_v46 = vpop.f32.mrb[14].mxu0 }
 0x818   :  { %v808_v47 = vadd.f32 %v803_v45, %v798_v43  ;;  %v799_v48 = vmul.f32 %v794_v46, %v748_v18  ;;  %v1250_v49 = vpop.f32.mrb[15].mxu0 }
 0x81a   :  { %v812_v51 = vmin.f32 %v808_v47, 0.0  ;;  %v809_v24 = vadd.f32 %v805_v50, %v799_v48  ;;  %vm810_vm12 = vcmp.gt.f32.partialorder %v808_v47, 0.0 }
 0x81c   :  { %v814_v27 = vmul.f32 1.442695, %v812_v51  ;;  %v813_v52 = vmin.f32 %v809_v24, 0.0  ;;  %vm811_vm13 = vcmp.gt.f32.partialorder %v809_v24, 0.0 }
 0x81e   :  { %1346 = vpow2.f32 %v814_v27  ;;  %v816_v53 = vmul.f32 1.442695, %v813_v52 }
 0x820   :  { %1348 = vpow2.f32 %v816_v53 }
 0x821   :  { %1350 = vrcp.f32 %v628_v62 }
 0x822   :  { %1352 = vrcp.f32 %v631_v63 }
 0x828   :  { %v1347_v55 = vpop.eup %1346 }
 0x829   :  { %v1162_v56 = vadd.f32 -1.0, %v1347_v55 }
 0x82a   :  { %v1349_v57 = vpop.eup %1348 }
 0x82b   :  { %v1163_v58 = vadd.f32 -1.0, %v1349_v57  ;;  %v820_v59 = vsel %vm810_vm12, %v808_v47, %v1162_v56  ;;  %v1351_v1 = vpop.eup %1350 }
 0x82c   :  { %v1353_v2 = vpop.eup %1352  ;;  %v636_v3 = vsel %vm632_vm14, %v1351_v1, 0.0 }
 0x82d   :  { %v821_v60 = vsel %vm811_vm13, %v809_v24, %v1163_v58  ;;  %v637_v7 = vsel %vm633_vm1, %v1353_v2, 0.0 }
 0x82e   :  { %v1296_v61 = vpack.i.bf16 %v821_v60, %v820_v59 }
 0x830   :  { %1297 = vrot.lane.b32.xlu1 %v1296_v61, %s1403_s4 }
 0x849   :  { %v676_v4 = vpop.f32.mrb[12].mxu1 }
 0x84a   :  { %v683_v5 = vmul.f32 %v676_v4, %v636_v3  ;;  %v1243_v6 = vpop.f32.mrb[13].mxu1 }
 0x84b   :  { %v679_v8 = vpop.f32.mrb[14].mxu1 }
 0x84c   :  { %v685_v9 = vadd.f32 %v683_v5, %v1560_v21  ;;  %v684_v10 = vmul.f32 %v679_v8, %v637_v7  ;;  %v1244_v11 = vpop.f32.mrb[15].mxu1  ;;  %v1087_v8 = vld [vmem:[%s1662_s8] sm:$0xf] }
 0x84e   :  { %v686_v12 = vadd.f32 %v684_v10, %v1563_v28  ;;  %v689_v13 = vmin.f32 %v685_v9, 0.0  ;;  %vm687_vm5 = vcmp.gt.f32.partialorder %v685_v9, 0.0 }
 0x850   :  { %v690_v14 = vmin.f32 %v686_v12, 0.0  ;;  %v691_v15 = vmul.f32 1.442695, %v689_v13  ;;  %vm688_vm6 = vcmp.gt.f32.partialorder %v686_v12, 0.0 }
 0x852   :  { %v693_v16 = vmul.f32 1.442695, %v690_v14  ;;  %1354 = vpow2.f32 %v691_v15 }
 0x854   :  { %1356 = vpow2.f32 %v693_v16 }
 0x85c   :  { %v1355_v17 = vpop.eup %1354 }
 0x85d   :  { %v1159_v20 = vadd.f32 -1.0, %v1355_v17 }
 0x85e   :  { %v1357_v19 = vpop.eup %1356 }
 0x85f   :  { %v1160_v22 = vadd.f32 -1.0, %v1357_v19  ;;  %v697_v21 = vsel %vm687_vm5, %v685_v9, %v1159_v20 }
 0x861   :  { %v698_v32 = vsel %vm688_vm6, %v686_v12, %v1160_v22 }
 0x8a2   :  { %v1298_v23 = vpop.permute.xlu1 %1297 }
 0x8a3   :  { %v1300_v25 = vunpack.i.h.bf16 %v1298_v23  ;;  %v1299_v29 = vunpack.i.l.bf16 %v1298_v23 }
 0x8a5   :  { %v830_v33 = vsel %vm442_vm15, %v697_v21, %v1299_v29  ;;  %v831_v28 = vsel %vm442_vm15, %v698_v32, %v1300_v25 }
 0x8a6   :  { %v832_v34 = vpack.c.bf16 %v831_v28, %v830_v33 }
 0x8a8   :  { %1254 = vmatmul.mubr.msk.bf16.vlgmr.msra.gmra.mrb[16].mxu1 %vm124_vm2, %v832_v34  ;;  %1260 = vmatmul.mubr.msk.bf16.vlgmr.msra.gmra.mrb[16].mxu0 %vm124_vm2, %v832_v34 }
 0x8a9   :  { %1265 = vmatprep.mubr.msk.bf16.mxu1 %vm1398_vm0, %v1397_v0  ;;  %1271 = vmatprep.mubr.msk.bf16.mxu0 %vm1398_vm0, %v1397_v0 }
 0x97b   :  { %v878_v36 = vpop.f32.mrb[16].mxu1  ;;  %v1622_v37 = vpop.f32.mrb[16].mxu0 }
 0x97c   :  { %v1261_v38 = vpop.f32.mrb[17].mxu0  ;;  %887 = vrot.lane.b32.xlu0 %v878_v36, %s1402_s0  ;;  %v1255_v39 = vpop.f32.mrb[17].mxu1 }
 0x97d   :  { %v881_v40 = vpop.f32.mrb[18].mxu1  ;;  %v1625_v41 = vpop.f32.mrb[18].mxu0 }
 0x97e   :  { %v974_v42 = vpack.c.bf16 %v881_v40, %v878_v36  ;;  %v1262_v43 = vpop.f32.mrb[19].mxu0  ;;  %889 = vrot.lane.b32.xlu1 %v881_v40, %s1402_s0  ;;  %v1256_v44 = vpop.f32.mrb[19].mxu1 }
 0x980   :  { %1264 = vmatpush3.bf16.msra.mxu1 %v974_v42 }
 0x982   :  { %976 = vperm.xlu1 %1301, %v878_v36  }
 0x986   :  { %980 = vperm.xlu1 %1301, %v881_v40  }
 0x9ee   :  { %v888_v0 = vpop.permute.xlu0 %887 }
 0x9ef   :  { %893 = vxpose.xlu0.b32.start [1/2] (short) (narrow) %v888_v0, 8 }
 0x9f0   :  { %v890_v45 = vpop.permute.xlu1 %889 }
 0x9f3   :  { %894 = vxpose.xlu0.b32.end [2/2] (short) (narrow) %v890_v45, 8 }
 0xa01   :  { %v977_v18 = vpop.permute.xlu1 %976 }
 0xa05   :  { %v981_v48 = vpop.permute.xlu1 %980 }
 0xa1c   :  { %1302 = vset.pattern.permute.xlu0 %v1404_v35 }
 0xa6f   :  { %v909_v46 = vpop.trf.xlu0 }
 0xa70   :  { %v986_v47 = vrot.slane %v909_v46, %v1503_v26 }
 0xa72   :  { %v987_v49 = vadd.f32 %v986_v47, %v977_v18  ;;  %v988_v50 = vadd.f32 %v986_v47, %v981_v48 }
 0xa74   :  { %vm989_vm0 = vcmp.gt.f32.partialorder %v987_v49, 0.0  ;;  %v991_v51 = vmul.f32 0.2, %v987_v49  ;;  %vm990_vm7 = vcmp.gt.f32.partialorder %v988_v50, 0.0  ;;  %v992_v24 = vmul.f32 0.2, %v988_v50 }
 0xa76   :  { %v993_v27 = vsel %vm989_vm0, %v987_v49, %v991_v51  ;;  %v994_v52 = vsel %vm990_vm7, %v988_v50, %v992_v24 }
 0xa77   :  { %v995_v53 = vsel %vm230_vm4, %v993_v27, -1e+09  ;;  %v996_v54 = vsel %vm231_vm3, %v994_v52, -1e+09  ;;  %vm1091_vm3 = vcmask 1043456  }
 0xa78   :  { %v997_v55 = vsel %vm124_vm2, %v995_v53, -inf  ;;  %v1000_v56 = vsel %vm124_vm2, %v996_v54, -inf  ;;  %v1093_v9 = vsel %vm1091_vm3, %v1087_v8, 0 }
 0xa79   :  { %998 = vmax.xlane.f32.xlu1 %v997_v55  ;;  %1001 = vmax.xlane.f32.xlu0 %v1000_v56 }
 0xa7a   :  { %1270 = vmatpush3.bf16.msra.mxu0 %v1093_v9 }
 0xb06   :  { %v1002_v26 = vpop.xlane.xlu0 %1001  ;;  %v999_v57 = vpop.xlane.xlu1 %998 }
 0xb07   :  { %v1004_v58 = vsub.f32 %v994_v52, %v1002_v26  ;;  %v1003_v59 = vsub.f32 %v993_v27, %v999_v57 }
 0xb09   :  { %v1006_v60 = vmin.f32 %v1004_v58, 0.0  ;;  %v1005_v61 = vmin.f32 %v1003_v59, 0.0 }
 0xb0b   :  { %v1009_v62 = vmul.f32 1.442695, %v1006_v60  ;;  %v1007_v63 = vmul.f32 1.442695, %v1005_v61 }
 0xb0d   :  { %1358 = vpow2.f32 %v1009_v62 }
 0xb0e   :  { %1360 = vpow2.f32 %v1007_v63 }
 0xb17   :  { %v1359_v1 = vpop.eup %1358 }
 0xb18   :  { %v1361_v2 = vpop.eup %1360  ;;  %v1012_v3 = vmul.f32 %v1359_v1, %v1509_v30 }
 0xb19   :  { %v1011_v4 = vmul.f32 %v1361_v2, %v1511_v31 }
 0xb1a   :  { %v1016_v7 = vsel %vm124_vm2, %v1012_v3, 0.0 }
 0xb1b   :  { %v1013_v5 = vsel %vm124_vm2, %v1011_v4, 0.0  ;;  %v1025_v6 = vpack.c.bf16 %v1012_v3, %v1011_v4 }
 0xb1c   :  { %1014 = vadd.xlane.f32.xlu1 %v1013_v5 }
 0xb1d   :  { %1266 = vmatmul.mubr.msk.bf16.vlgmr.msra.gmra.mrb[20].mxu1 %vm124_vm2, %v1025_v6 }
 0xb20   :  { %1017 = vadd.xlane.f32.xlu1 %v1016_v7 }
 0xba9   :  { %v1015_v10 = vpop.xlane.xlu1 %1014 }
 0xbaa   :  { %1362 = vrcp.f32 %v1015_v10  ;;  %vm1019_vm4 = vcmp.gt.f32.partialorder %v1015_v10, 0.0 }
 0xbad   :  { %v1018_v30 = vpop.xlane.xlu1 %1017 }
 0xbae   :  { %1364 = vrcp.f32 %v1018_v30  ;;  %vm1020_vm8 = vcmp.gt.f32.partialorder %v1018_v30, 0.0 }
 0xbb4   :  { %v1363_v31 = vpop.eup %1362 }
 0xbb5   :  { %v1023_v12 = vsel %vm1019_vm4, %v1363_v31, 0.0 }
 0xbb8   :  { %v1365_v11 = vpop.eup %1364 }
 0xbb9   :  { %v1024_v16 = vsel %vm1020_vm8, %v1365_v11, 0.0 }
 0xbf0   :  { %v1063_v13 = vpop.f32.mrb[20].mxu1 }
 0xbf1   :  { %v1070_v14 = vmul.f32 %v1063_v13, %v1023_v12  ;;  %v1267_v15 = vpop.f32.mrb[21].mxu1 }
 0xbf2   :  { %v1066_v17 = vpop.f32.mrb[22].mxu1 }
 0xbf3   :  { %v1072_v19 = vadd.f32 %v1070_v14, %v1622_v37  ;;  %v1071_v20 = vmul.f32 %v1066_v17, %v1024_v16  ;;  %v1268_v22 = vpop.f32.mrb[23].mxu1 }
 0xbf5   :  { %v1076_v23 = vmin.f32 %v1072_v19, 0.0  ;;  %v1073_v25 = vadd.f32 %v1071_v20, %v1625_v41  ;;  %vm1074_vm2 = vcmp.gt.f32.partialorder %v1072_v19, 0.0 }
 0xbf7   :  { %v1078_v29 = vmul.f32 1.442695, %v1076_v23  ;;  %v1077_v21 = vmin.f32 %v1073_v25, 0.0  ;;  %vm1075_vm9 = vcmp.gt.f32.partialorder %v1073_v25, 0.0 }
 0xbf9   :  { %1366 = vpow2.f32 %v1078_v29  ;;  %v1080_v32 = vmul.f32 1.442695, %v1077_v21 }
 0xbfb   :  { %1368 = vpow2.f32 %v1080_v32 }
 0xc03   :  { %v1367_v33 = vpop.eup %1366 }
 0xc04   :  { %v1169_v28 = vadd.f32 -1.0, %v1367_v33 }
 0xc05   :  { %v1369_v34 = vpop.eup %1368 }
 0xc06   :  { %v1170_v35 = vadd.f32 -1.0, %v1369_v34  ;;  %v1084_v36 = vsel %vm1074_vm2, %v1072_v19, %v1169_v28 }
 0xc08   :  { %v1085_v38 = vsel %vm1075_vm9, %v1073_v25, %v1170_v35 }
 0xc09   :  { %v1086_v39 = vpack.c.bf16 %v1085_v38, %v1084_v36 }
 0xc0b   :  { %1272 = vmatmul.mubr.msk.bf16.vlgmr.msra.gmra.mrb[20].mxu0 %vm442_vm15, %v1086_v39 }
 0xcde   :  { %v1129_v37 = vpop.f32.mrb[20].mxu0 }
 0xcdf   :  { %1136 = vst.msk [vmem:[%s1663_s9] sm:$0xff] %vm442_vm15, %v1129_v37  ;;  %v1273_v40 = vpop.f32.mrb[21].mxu0 }
 0xce0   :  { %v1132_v41 = vpop.f32.mrb[22].mxu0 }
 0xce1   :  { %1137 = vst.msk [vmem:[%s1663_s9 + $0x8] sm:$0xff] %vm442_vm15, %v1132_v41  ;;  %v1274_v42 = vpop.f32.mrb[23].mxu0 }
 0xce2   :  { %1142 = vsyncpa [#allocation3], 1 }

</bundles_post_ra>
